<compile_context>
chip_gen: v7x
topology: tpu7x:2x2x1
jax: 0.10.0
libtpu: 0.0.40
codegen_flags: <defaults>
</compile_context>

<pallas_src>
import functools
import math

import jax
import jax.numpy as jnp
from jax.experimental import pallas as pl
from jax.experimental.pallas import tpu as pltpu

_LANE = 128     # TPU lane width; num_labels output dim is padded to a full lane slab.
_SUBLANE = 8    # sublane height; seq block is 8-aligned so the CLS tile is layout-legal.


def _gelu_exact(x):
    # Matches torch.nn.functional.gelu default (erf-based, not tanh approximation).
    return x * 0.5 * (1.0 + jax.lax.erf(x / jnp.sqrt(2.0).astype(x.dtype)))


def head_kernel(x_ref, wd_ref, bd_ref, wo_ref, bo_ref, out_ref):
    """out = out_proj(gelu(dense(features[:, 0, :]))), lane-dense padded output.

    x_ref : (bm, seq_blk, H)  features tile covering seq positions [0, seq_blk);
                              row 0 of the seq axis is the CLS token.
    wd_ref: (H, H)            dense weight, pre-transposed offline so y = x @ W + b
    bd_ref: (1, H)            dense bias
    wo_ref: (H, Lpad)         out_proj weight, pre-transposed + zero-padded to 128 lanes
    bo_ref: (1, Lpad)         out_proj bias, zero-padded
    out   : (bm, Lpad)        padded logits (padded columns are exactly zero)
    """
    x = x_ref[...][:, 0, :]                                   # (bm, H) CLS features
    h = jnp.dot(x, wd_ref[...], preferred_element_type=jnp.float32) + bd_ref[...]
    h = _gelu_exact(h)
    o = jnp.dot(h, wo_ref[...], preferred_element_type=jnp.float32) + bo_ref[...]
    out_ref[...] = o.astype(out_ref.dtype)


def prepare_head_params(params, dtype=jnp.float32):
    """One-time parameter prep (model-load time, NOT per forward call).

    - Transposes PyTorch Linear weights from (out, in) to (in, out).
    - Reshapes biases to 2-D rows.
    - Zero-pads out_proj to a full 128-lane output slab so the kernel's store
      is unmasked / lane-dense.
    """
    H = params["dense_w"].shape[1]
    L = params["out_proj_w"].shape[0]
    l_pad = max(_LANE, ((L + _LANE - 1) // _LANE) * _LANE)

    wd = jnp.asarray(params["dense_w"], dtype).T                        # (H, H)
    bd = jnp.asarray(params["dense_b"], dtype).reshape(1, H)            # (1, H)
    wo = jnp.zeros((H, l_pad), dtype).at[:, :L].set(
        jnp.asarray(params["out_proj_w"], dtype).T)                     # (H, Lpad)
    bo = jnp.zeros((1, l_pad), dtype).at[:, :L].set(
        jnp.asarray(params["out_proj_b"], dtype))                       # (1, Lpad)
    return dict(wd=wd, bd=bd, wo=wo, bo=bo, num_labels=L)


def _head_pallas(features, wd, bd, wo, bo):
    B, S, H = features.shape
    l_pad = wo.shape[1]
    # Seq tile: 8 rows (sublane-aligned) covering the CLS token, or full S if tiny.
    seq_blk = S if S < _SUBLANE else _SUBLANE
    # Batch tile: whole batch for small B; 256-row blocks for the large-B path
    # so the "parallel" grid axis can shard across both v7x TensorCores.
    bm = 256 if (B > 256 and B % 256 == 0) else B
    grid = (B // bm,)

    itemsize = jnp.dtype(features.dtype).itemsize
    cost = pl.CostEstimate(
        flops=2 * B * H * H + 2 * B * H * l_pad,
        transcendentals=B * H,  # erf per element of the hidden activation
        bytes_accessed=(B * seq_blk * H + wd.size + bd.size + wo.size + bo.size
                        + B * l_pad) * itemsize,
    )

    return pl.pallas_call(
        head_kernel,
        out_shape=jax.ShapeDtypeStruct((B, l_pad), features.dtype),
        grid=grid,
        in_specs=[
            # CLS tile straight out of the full (B, S, H) features array.
            pl.BlockSpec((bm, seq_blk, H), lambda i: (i, 0, 0)),
            # Weights/biases: constant block index -> DMA'd once, VMEM-resident.
            pl.BlockSpec((H, H), lambda i: (0, 0)),
            pl.BlockSpec((1, H), lambda i: (0, 0)),
            pl.BlockSpec((H, l_pad), lambda i: (0, 0)),
            pl.BlockSpec((1, l_pad), lambda i: (0, 0)),
        ],
        out_specs=pl.BlockSpec((bm, l_pad), lambda i: (i, 0)),
        compiler_params=pltpu.CompilerParams(dimension_semantics=("parallel",)),
        cost_estimate=cost,
    )(features, wd, bd, wo, bo)


@functools.partial(jax.jit, static_argnums=(5, 6))
def _forward(features, wd, bd, wo, bo, num_labels, keep_padded):
    out_pad = _head_pallas(features, wd, bd, wo, bo)
    if keep_padded:
        return out_pad               # (B, 128) lane-dense slab; cols >= num_labels are 0
    return out_pad[:, :num_labels]   # module-faithful (B, num_labels), fused in this jit


def relation_classification_head(features, prepared, keep_padded=False):
    """Pallas implementation of GPNNbasedRelationClassificationHead.forward (eval)."""
    return _forward(features, prepared["wd"], prepared["bd"],
                    prepared["wo"], prepared["bo"],
                    prepared["num_labels"], keep_padded)


def _reference(features, params):
    """Pure-JAX reference mirroring the PyTorch forward (eval mode)."""
    # Dead dense_mid branch of the reference, reproduced for fidelity and then
    # discarded exactly like the PyTorch module does.
    x = jnp.transpose(features, (0, 2, 1))                              # (B, H, S)
    x = x @ params["dense_mid_w"].T + params["dense_mid_b"]             # (B, H, 1)
    x = _gelu_exact(x)
    x = jnp.transpose(x, (0, 2, 1))                                     # (B, 1, H)
    # ... and overwritten:
    x = features[:, 0, :]
    x = _gelu_exact(x @ params["dense_w"].T + params["dense_b"])
    x = x @ params["out_proj_w"].T + params["out_proj_b"]
    return x


if __name__ == "__main__":
    # Small shapes consistent with the module: seq_len must be 128 because of
    # nn.Linear(128, 1) in __init__; hidden and num_labels kept small.
    B, S, H, L = 8, 128, 32, 4

    key = jax.random.PRNGKey(0)
    keys = jax.random.split(key, 8)
    features = jax.random.normal(keys[0], (B, S, H), dtype=jnp.float32)

    def _init_linear(kw, kb, out_dim, in_dim):
        bound = 1.0 / math.sqrt(in_dim)
        w = jax.random.uniform(kw, (out_dim, in_dim), jnp.float32, -bound, bound)
        b = jax.random.uniform(kb, (out_dim,), jnp.float32, -bound, bound)
        return w, b

    dense_w, dense_b = _init_linear(keys[1], keys[2], H, H)             # nn.Linear(H, H)
    dense_mid_w, dense_mid_b = _init_linear(keys[3], keys[4], 1, 128)   # nn.Linear(128, 1) -- dead code path
    out_proj_w, out_proj_b = _init_linear(keys[5], keys[6], L, H)       # nn.Linear(H, L)

    params = dict(
        dense_w=dense_w, dense_b=dense_b,
        dense_mid_w=dense_mid_w, dense_mid_b=dense_mid_b,
        out_proj_w=out_proj_w, out_proj_b=out_proj_b,
    )

    prepared = prepare_head_params(params)          # one-time, outside the forward path

    out = relation_classification_head(features, prepared)
    out = jax.block_until_ready(out)

    # Also exercise the lane-padded consumer path once (padded cols must be 0).
    out_pad = jax.block_until_ready(
        relation_classification_head(features, prepared, keep_padded=True))

    ref = jax.block_until_ready(_reference(features, params))
    assert out.shape == (B, L)
    assert out_pad.shape == (B, _LANE)
    assert jnp.allclose(out, ref, atol=1e-5, rtol=1e-5), "mismatch vs reference"
    assert jnp.allclose(out_pad[:, :L], ref, atol=1e-5, rtol=1e-5), "padded mismatch"
    assert jnp.all(out_pad[:, L:] == 0.0), "padded columns must be exactly zero"

    print("KERNEL_OK")
</pallas_src>

<mosaic_0001>
module attributes {stable_mosaic.version = 11 : i64} {
  func.func @head_kernel(%arg0: i32, %arg1: memref<8x8x32xf32, #tpu.memory_space<vmem>>, %arg2: memref<32x32xf32, #tpu.memory_space<vmem>>, %arg3: memref<1x32xf32, #tpu.memory_space<vmem>>, %arg4: memref<32x128xf32, #tpu.memory_space<vmem>>, %arg5: memref<1x128xf32, #tpu.memory_space<vmem>>, %arg6: memref<8x128xf32, #tpu.memory_space<vmem>>) attributes {dimension_semantics = [#tpu.dimension_semantics<parallel>], iteration_bounds = array<i64: 1>, scalar_prefetch = 0 : i64, scratch_operands = 0 : i64, tpu.core_type = #tpu.core_type<tc>, window_params = [{transform_indices = @transform_0, window_bounds = array<i64: 8, 8, 32>}, {pipeline_mode = #tpu.pipeline_mode<synchronous>, transform_indices = @transform_1, window_bounds = array<i64: 32, 32>}, {pipeline_mode = #tpu.pipeline_mode<synchronous>, transform_indices = @transform_2, window_bounds = array<i64: 1, 32>}, {pipeline_mode = #tpu.pipeline_mode<synchronous>, transform_indices = @transform_3, window_bounds = array<i64: 32, 128>}, {pipeline_mode = #tpu.pipeline_mode<synchronous>, transform_indices = @transform_4, window_bounds = array<i64: 1, 128>}, {transform_indices = @transform_5, window_bounds = array<i64: 8, 128>}]} {
    %c0 = arith.constant 0 : index
    %c0_0 = arith.constant 0 : index
    %c0_1 = arith.constant 0 : index
    %0 = vector.load %arg1[%c0, %c0_0, %c0_1] : memref<8x8x32xf32, #tpu.memory_space<vmem>>, vector<8x8x32xf32>
    %1 = vector.extract_strided_slice %0 {offsets = [0, 0, 0], sizes = [8, 1, 32], strides = [1, 1, 1]} : vector<8x8x32xf32> to vector<8x1x32xf32>
    %2 = vector.shape_cast %1 : vector<8x1x32xf32> to vector<8x32xf32>
    %c0_2 = arith.constant 0 : index
    %c0_3 = arith.constant 0 : index
    %3 = vector.load %arg2[%c0_2, %c0_3] : memref<32x32xf32, #tpu.memory_space<vmem>>, vector<32x32xf32>
    %cst = arith.constant dense<0.000000e+00> : vector<8x32xf32>
    %4 = tpu.matmul %2, %3, %cst {dimension_numbers = #tpu.dot_dimension_numbers<[1], [0], [0], [1], [0, 0, 1, 1], [], []>} : vector<8x32xf32>, vector<32x32xf32>, vector<8x32xf32> -> vector<8x32xf32>
    %c0_4 = arith.constant 0 : index
    %c0_5 = arith.constant 0 : index
    %5 = vector.load %arg3[%c0_4, %c0_5] : memref<1x32xf32, #tpu.memory_space<vmem>>, vector<1x32xf32>
    %6 = vector.broadcast %5 : vector<1x32xf32> to vector<8x32xf32>
    %7 = arith.addf %4, %6 : vector<8x32xf32>
    %cst_6 = arith.constant 5.000000e-01 : f32
    %8 = vector.broadcast %cst_6 : f32 to vector<8x32xf32>
    %9 = arith.mulf %7, %8 : vector<8x32xf32>
    %cst_7 = arith.constant 2.000000e+00 : f32
    %10 = math.sqrt %cst_7 : f32
    %11 = vector.broadcast %10 : f32 to vector<8x32xf32>
    %12 = arith.divf %7, %11 : vector<8x32xf32>
    %13 = math.erf %12 : vector<8x32xf32>
    %cst_8 = arith.constant 1.000000e+00 : f32
    %14 = vector.broadcast %cst_8 : f32 to vector<8x32xf32>
    %15 = arith.addf %14, %13 : vector<8x32xf32>
    %16 = arith.mulf %9, %15 : vector<8x32xf32>
    %c0_9 = arith.constant 0 : index
    %c0_10 = arith.constant 0 : index
    %17 = vector.load %arg4[%c0_9, %c0_10] : memref<32x128xf32, #tpu.memory_space<vmem>>, vector<32x128xf32>
    %cst_11 = arith.constant dense<0.000000e+00> : vector<8x128xf32>
    %18 = tpu.matmul %16, %17, %cst_11 {dimension_numbers = #tpu.dot_dimension_numbers<[1], [0], [0], [1], [0, 0, 1, 1], [], []>} : vector<8x32xf32>, vector<32x128xf32>, vector<8x128xf32> -> vector<8x128xf32>
    %c0_12 = arith.constant 0 : index
    %c0_13 = arith.constant 0 : index
    %19 = vector.load %arg5[%c0_12, %c0_13] : memref<1x128xf32, #tpu.memory_space<vmem>>, vector<1x128xf32>
    %20 = vector.broadcast %19 : vector<1x128xf32> to vector<8x128xf32>
    %21 = arith.addf %18, %20 : vector<8x128xf32>
    %c0_14 = arith.constant 0 : index
    %c0_15 = arith.constant 0 : index
    %22 = vector.load %arg6[%c0_14, %c0_15] : memref<8x128xf32, #tpu.memory_space<vmem>>, vector<8x128xf32>
    tpu.vector_store %arg6[%c0_14, %c0_15], %21 {strides = array<i32>} : memref<8x128xf32, #tpu.memory_space<vmem>>, vector<8x128xf32>,
    return
  }
  func.func @transform_0(%arg0: i32) -> (i32, i32, i32) {
    %c0_i32 = arith.constant 0 : i32
    %c0_i32_0 = arith.constant 0 : i32
    %c0_i32_1 = arith.constant 0 : i32
    return %arg0, %c0_i32, %c0_i32_0 : i32, i32, i32
  }
  func.func @transform_1(%arg0: i32) -> (i32, i32) {
    %c0_i32 = arith.constant 0 : i32
    %c0_i32_0 = arith.constant 0 : i32
    %c0_i32_1 = arith.constant 0 : i32
    return %c0_i32, %c0_i32_0 : i32, i32
  }
  func.func @transform_2(%arg0: i32) -> (i32, i32) {
    %c0_i32 = arith.constant 0 : i32
    %c0_i32_0 = arith.constant 0 : i32
    %c0_i32_1 = arith.constant 0 : i32
    return %c0_i32, %c0_i32_0 : i32, i32
  }
  func.func @transform_3(%arg0: i32) -> (i32, i32) {
    %c0_i32 = arith.constant 0 : i32
    %c0_i32_0 = arith.constant 0 : i32
    %c0_i32_1 = arith.constant 0 : i32
    return %c0_i32, %c0_i32_0 : i32, i32
  }
  func.func @transform_4(%arg0: i32) -> (i32, i32) {
    %c0_i32 = arith.constant 0 : i32
    %c0_i32_0 = arith.constant 0 : i32
    %c0_i32_1 = arith.constant 0 : i32
    return %c0_i32, %c0_i32_0 : i32, i32
  }
  func.func @transform_5(%arg0: i32) -> (i32, i32) {
    %c0_i32 = arith.constant 0 : i32
    %c0_i32_0 = arith.constant 0 : i32
    return %arg0, %c0_i32 : i32, i32
  }
}

</mosaic_0001>

<bundles_post_ra>
// kernel: _forward.1
= control target key start
LH: loop header
LB: loop body
LE: loop exit
PB: predicated region body
PF: predicated region fallthrough
CT: control target
= control target key end

     0   :  { %v355_v3 = vmov 0.0|0.0   ;;  %vm356_vm0 = vmmov 0   ;;  %v357_v6 = vmov 0.0   ;;  %vm110_vm1 = vcmask 1041409   ;;  %s450_s0 = inlined_call_operand.vmem [shape: f32[8,128,32], index: 0, kind: input, shape index: {}]   ;;  %s451_s1 = inlined_call_operand.vmem [shape: f32[32,32], index: 1, kind: input, shape index: {}]   ;;  %s452_s2 = inlined_call_operand.vmem [shape: f32[1,32], index: 2, kind: input, shape index: {}]   ;;  %s453_s3 = inlined_call_operand.vmem [shape: f32[32,128], index: 3, kind: input, shape index: {}]   ;;  %s454_s4 = inlined_call_operand.vmem [shape: f32[1,128], index: 4, kind: input, shape index: {}]   ;;  %s455_s5 = inlined_call_operand.vmem [shape: f32[8,128], index: 5, kind: output, shape index: {}]  }
   0x1   :  { %v90_v0 = vld [vmem:[%s451_s1] sm:$0xff]  ;;  %v91_v1 = vld [vmem:[%s451_s1 + $0x8] sm:$0xff]  ;;  %v92_v2 = vld [vmem:[%s451_s1 + $0x10] sm:$0xff]  ;;  %338 = vmatprep.subr.bf16.mxu0 %v355_v3  ;;  %324 = vmatprep.mubr.msk.f32.mxu0 %vm356_vm0, %v357_v6  ;;  %vm113_vm2 = vcmask 1042434   ;;  %vm116_vm3 = vcmask 1043459   ;;  %vm119_vm4 = vcmask 1044484  }
   0x2   :  { %v339_v4 = vpack.c.bf16 %v91_v1, %v90_v0  ;;  %v93_v5 = vld [vmem:[%s451_s1 + $0x18] sm:$0xff]  ;;  %v53_v7 = vld [vmem:[%s450_s0] sm:$0xff]  ;;  %344 = vmatprep.subr.bf16.mxu1 %v355_v3  ;;  %335 = vmatprep.mubr.msk.f32.mxu1 %vm356_vm0, %v357_v6  ;;  %vm122_vm5 = vcmask 1045509   ;;  %vm125_vm6 = vcmask 1046534   ;;  %vm128_vm7 = vcmask 1047559   ;;  %v210_v31 = vld [vmem:[%s453_s3 + $0x8] sm:$0xff] }
   0x3   :  { %v55_v8 = vld [vmem:[%s450_s0 + $0x80] sm:$0xff]  ;;  %v342_v13 = vpack.c.bf16 %v93_v5, %v92_v2  ;;  %vm130_vm8 = vcmask 261120   ;;  %v211_v33 = vld [vmem:[%s453_s3 + $0x10] sm:$0xff]  ;;  %v212_v34 = vld [vmem:[%s453_s3 + $0x18] sm:$0xff] }
   0x4   :  { %v57_v9 = vld [vmem:[%s450_s0 + $0x100] sm:$0xff]  ;;  %v109_v12 = vrot.slane %v55_v8, 7  ;;  %340 = vmatpush3.bf16.msra.mxu0 %v339_v4  ;;  %v348_v35 = vpack.c.bf16 %v212_v34, %v211_v33 }
   0x5   :  { %v59_v10 = vld [vmem:[%s450_s0 + $0x180] sm:$0xff]  ;;  %v112_v17 = vrot.slane %v57_v9, 6  ;;  %341 = vmatprep.subr.bf16.mxu0 %v355_v3 }
   0x6   :  { %v61_v11 = vld [vmem:[%s450_s0 + $0x200] sm:$0xff]  ;;  %v115_v18 = vrot.slane %v59_v10, 5  ;;  %v111_v20 = vsel %vm110_vm1, %v109_v12, %v53_v7 }
   0x7   :  { %v63_v14 = vld [vmem:[%s450_s0 + $0x280] sm:$0xff]  ;;  %v118_v19 = vrot.slane %v61_v11, 4  ;;  %v114_v22 = vsel %vm113_vm2, %v112_v17, %v111_v20 }
   0x8   :  { %v65_v15 = vld [vmem:[%s450_s0 + $0x300] sm:$0xff]  ;;  %v121_v21 = vrot.slane %v63_v14, 3  ;;  %v117_v24 = vsel %vm116_vm3, %v115_v18, %v114_v22  ;;  %343 = vmatpush3.bf16.msra.mxu0 %v342_v13 }
   0x9   :  { %v67_v16 = vld [vmem:[%s450_s0 + $0x380] sm:$0xff]  ;;  %v124_v23 = vrot.slane %v65_v15, 2  ;;  %v120_v26 = vsel %vm119_vm4, %v118_v19, %v117_v24 }
   0xa   :  { %v127_v25 = vrot.slane %v67_v16, 1  ;;  %v123_v27 = vsel %vm122_vm5, %v121_v21, %v120_v26  ;;  %v209_v30 = vld [vmem:[%s453_s3] sm:$0xff] }
   0xb   :  { %v126_v28 = vsel %vm125_vm6, %v124_v23, %v123_v27  ;;  %v345_v32 = vpack.c.bf16 %v210_v31, %v209_v30  ;;  %v302_v36 = vld [vmem:[%s452_s2] ss:$0 sm:$0xff] }
   0xc   :  { %v129_v29 = vsel %vm128_vm7, %v127_v25, %v126_v28  ;;  %v304_v45 = vld [vmem:[%s454_s4] ss:$0 sm:$0xff] }
   0xd   :  { %325 = vmatmul.mubr.msk.f32.vlgmr.msra.gmra.mrb[0].mxu0 %vm130_vm8, %v129_v29  ;;  %346 = vmatpush3.bf16.msra.mxu1 %v345_v32 }
   0xe   :  { %347 = vmatprep.subr.bf16.mxu1 %v355_v3 }
  0x11   :  { %349 = vmatpush3.bf16.msra.mxu1 %v348_v35 }
  0xe0   :  { %v199_v37 = vpop.f32.mrb[0].mxu0 }
  0xe1   :  { %v200_v38 = vadd.f32 %v302_v36, %v199_v37  ;;  %v326_v39 = vpop.f32.mrb[1].mxu0 }
  0xe3   :  { %v205_v40 = vmul.f32 0.70710677, %v200_v38  ;;  %v203_v42 = vmul.f32 0.5, %v200_v38 }
  0xe5   :  { %353 = verf.f32 %v205_v40 }
  0xef   :  { %v354_v41 = vpop.eup %353 }
  0xf0   :  { %v207_v43 = vadd.f32 1.0, %v354_v41 }
  0xf2   :  { %v208_v44 = vmul.f32 %v207_v43, %v203_v42 }
  0xf4   :  { %336 = vmatmul.mubr.msk.f32.vlgmr.msra.gmra.mrb[0].mxu1 %vm130_vm8, %v208_v44 }
 0x1c7   :  { %v289_v46 = vpop.f32.mrb[0].mxu1 }
 0x1c8   :  { %v290_v47 = vadd.f32 %v304_v45, %v289_v46  ;;  %v337_v48 = vpop.f32.mrb[1].mxu1 }
 0x1ca   :  { %293 = vst [vmem:[%s455_s5] sm:$0xff] %v290_v47 }

</bundles_post_ra>
